<compile_context>
chip_gen: v7x
topology: tpu7x:2x2x1
jax: 0.10.0
libtpu: 0.0.40
codegen_flags: <defaults>
</compile_context>

<pallas_src>
import functools

import numpy as np
import jax
import jax.numpy as jnp
from jax.experimental import pallas as pl
from jax.experimental.pallas import tpu as pltpu


# ----------------------------- Pallas kernels ------------------------------ #

def _matmul_bn_kernel(x_ref, w_ref, shift_ref, o_ref, *, relu):
    # y = [relu]( x @ w + shift );  BN scale is pre-folded into w.
    y = jnp.dot(x_ref[...], w_ref[...],
                preferred_element_type=jnp.float32) + shift_ref[...]
    if relu:
        y = jnp.maximum(y, 0.0)
    o_ref[...] = y.astype(o_ref.dtype)


def _matmul_bn_res_kernel(x_ref, w_ref, shift_ref, res_ref, o_ref, *, relu):
    # y = [relu]( x @ w + shift + residual )
    y = (jnp.dot(x_ref[...], w_ref[...], preferred_element_type=jnp.float32)
         + shift_ref[...] + res_ref[...].astype(jnp.float32))
    if relu:
        y = jnp.maximum(y, 0.0)
    o_ref[...] = y.astype(o_ref.dtype)


def _conv1_downsample_kernel(x_ref, w1_ref, wd_ref, s1_ref, sd_ref,
                             o1_ref, od_ref):
    # Fused conv1(+BN1+ReLU) and downsample(+BNd): x is loaded once per tile.
    x = x_ref[...]
    y1 = jnp.dot(x, w1_ref[...], preferred_element_type=jnp.float32) + s1_ref[...]
    o1_ref[...] = jnp.maximum(y1, 0.0).astype(o1_ref.dtype)
    yd = jnp.dot(x, wd_ref[...], preferred_element_type=jnp.float32) + sd_ref[...]
    od_ref[...] = yd.astype(od_ref.dtype)


def _dwconv3x3_bn_relu_kernel(x_ref, w_ref, shift_ref, o_ref, xp_ref, *, H, W, C):
    # Depthwise (groups == channels) 3x3 conv + BN shift + ReLU, one image per
    # grid step.  Zero-padding is done in VMEM (no padded tensor in HBM) and
    # the 9 taps are pure VPU multiply-accumulates (no MXU, no im2col).
    xp_ref[...] = jnp.zeros_like(xp_ref)
    xp_ref[1:H + 1, 1:W + 1, :] = x_ref[0].astype(jnp.float32)
    acc = jnp.zeros((H, W, C), jnp.float32)
    for kh in range(3):
        for kw in range(3):
            tap = kh * 3 + kw
            acc = acc + xp_ref[kh:kh + H, kw:kw + W, :] * w_ref[tap:tap + 1, :]
    y = jnp.maximum(acc + shift_ref[...], 0.0)
    o_ref[0] = y.astype(o_ref.dtype)


def _gconv3x3_bn_relu_kernel(x_ref, w_ref, shift_ref, o_ref, xp_ref, *, H, W, C):
    # Grouped 3x3 conv (gs > 1): 9 accumulated per-tap matmuls over a VMEM-padded
    # tile (still no im2col HBM materialization).
    # TODO(synk): the per-tap (C, C) matrices are block-diagonal, so the MXU does
    # cardinality-x wasted FLOPs here; a grid axis over groups would remove it.
    xp_ref[...] = jnp.zeros_like(xp_ref)
    xp_ref[1:H + 1, 1:W + 1, :] = x_ref[0].astype(jnp.float32)
    acc = jnp.zeros((H * W, C), jnp.float32)
    for kh in range(3):
        for kw in range(3):
            tap = kh * 3 + kw
            x_tap = xp_ref[kh:kh + H, kw:kw + W, :].reshape(H * W, C)
            acc = acc + jnp.dot(x_tap, w_ref[tap],
                                preferred_element_type=jnp.float32)
    y = jnp.maximum(acc + shift_ref[...], 0.0)
    o_ref[0] = y.reshape(H, W, C).astype(o_ref.dtype)


# ------------------------------ Pallas wrappers ----------------------------- #

def _row_tile(M, tm):
    tm = min(tm, M)
    if tm < M:
        tm = max(8, (tm // 8) * 8)
    return tm


def matmul_bn(x, w, shift, *, relu, residual=None, out_dtype=jnp.bfloat16, tm=512):
    """y = [relu]( (x @ w) + shift [+ residual] ), row-tiled; BN scale pre-folded."""
    M, K = x.shape
    K2, Nc = w.shape
    assert K == K2
    tm = _row_tile(M, tm)
    grid = (pl.cdiv(M, tm),)

    in_specs = [
        pl.BlockSpec((tm, K), lambda i: (i, 0)),     # activation row tile
        pl.BlockSpec((K, Nc), lambda i: (0, 0)),     # weight (scale folded)
        pl.BlockSpec((1, Nc), lambda i: (0, 0)),     # BN shift
    ]
    args = [x, w, shift]
    if residual is None:
        kernel = functools.partial(_matmul_bn_kernel, relu=relu)
    else:
        kernel = functools.partial(_matmul_bn_res_kernel, relu=relu)
        in_specs.append(pl.BlockSpec((tm, Nc), lambda i: (i, 0)))
        args.append(residual)

    return pl.pallas_call(
        kernel,
        out_shape=jax.ShapeDtypeStruct((M, Nc), out_dtype),
        grid=grid,
        in_specs=in_specs,
        out_specs=pl.BlockSpec((tm, Nc), lambda i: (i, 0)),
        compiler_params=pltpu.CompilerParams(dimension_semantics=("parallel",)),
    )(*args)


def conv1_with_downsample(x, w1, s1, wd, sd, *, tm=512):
    """Fused conv1(+BN1+ReLU) and downsample 1x1 conv(+BNd): x read once."""
    M, K = x.shape
    n1 = w1.shape[1]
    nd = wd.shape[1]
    tm = _row_tile(M, tm)
    grid = (pl.cdiv(M, tm),)
    return pl.pallas_call(
        _conv1_downsample_kernel,
        out_shape=(jax.ShapeDtypeStruct((M, n1), jnp.bfloat16),
                   jax.ShapeDtypeStruct((M, nd), jnp.bfloat16)),
        grid=grid,
        in_specs=[pl.BlockSpec((tm, K), lambda i: (i, 0)),
                  pl.BlockSpec((K, n1), lambda i: (0, 0)),
                  pl.BlockSpec((K, nd), lambda i: (0, 0)),
                  pl.BlockSpec((1, n1), lambda i: (0, 0)),
                  pl.BlockSpec((1, nd), lambda i: (0, 0))],
        out_specs=(pl.BlockSpec((tm, n1), lambda i: (i, 0)),
                   pl.BlockSpec((tm, nd), lambda i: (i, 0))),
        compiler_params=pltpu.CompilerParams(dimension_semantics=("parallel",)),
    )(x, w1, wd, s1, sd)


def grouped_conv3x3_bn_relu(h, w_taps, shift, gs):
    """Fused grouped 3x3 conv + BN shift + ReLU; grid over batch images."""
    N, H, W, C = h.shape
    if gs == 1:
        kernel = functools.partial(_dwconv3x3_bn_relu_kernel, H=H, W=W, C=C)
        w_spec = pl.BlockSpec((9, C), lambda n: (0, 0))
    else:
        kernel = functools.partial(_gconv3x3_bn_relu_kernel, H=H, W=W, C=C)
        w_spec = pl.BlockSpec((9, C, C), lambda n: (0, 0, 0))
    return pl.pallas_call(
        kernel,
        out_shape=jax.ShapeDtypeStruct((N, H, W, C), jnp.bfloat16),
        grid=(N,),
        in_specs=[pl.BlockSpec((1, H, W, C), lambda n: (n, 0, 0, 0)),
                  w_spec,
                  pl.BlockSpec((1, C), lambda n: (0, 0))],
        out_specs=pl.BlockSpec((1, H, W, C), lambda n: (n, 0, 0, 0)),
        scratch_shapes=[pltpu.VMEM((H + 2, W + 2, C), jnp.float32)],
        compiler_params=pltpu.CompilerParams(dimension_semantics=("parallel",)),
    )(h, w_taps, shift)


# ------------------------------- Parameters -------------------------------- #

def init_params(key, in_channels, out_channels, stride=1, cardinality=32):
    expansion = 2
    mid = out_channels // expansion
    gs = mid // cardinality  # in-channels per group for conv2
    keys = jax.random.split(key, 8)

    def conv_w(k, shape):
        fan_in = shape[1] * shape[2] * shape[3]
        bound = 1.0 / np.sqrt(fan_in)
        return jax.random.uniform(k, shape, jnp.float32, -bound, bound)

    def bn(k, c):
        kg, kb, km, kv = jax.random.split(k, 4)
        gamma = jax.random.uniform(kg, (c,), jnp.float32, 0.5, 1.5)
        beta = jax.random.uniform(kb, (c,), jnp.float32, -0.5, 0.5)
        mean = jax.random.uniform(km, (c,), jnp.float32, -0.1, 0.1)
        var = jax.random.uniform(kv, (c,), jnp.float32, 0.5, 1.5)
        return (gamma, beta, mean, var)

    params = {
        "w1": conv_w(keys[0], (mid, in_channels, 1, 1)),
        "w2": conv_w(keys[1], (mid, gs, 3, 3)),
        "w3": conv_w(keys[2], (out_channels, mid, 1, 1)),
        "bn1": bn(keys[3], mid),
        "bn2": bn(keys[4], mid),
        "bn3": bn(keys[5], out_channels),
    }
    if stride != 1 or in_channels != out_channels:
        params["wd"] = conv_w(keys[6], (out_channels, in_channels, 1, 1))
        params["bnd"] = bn(keys[7], out_channels)
    return params


def bn_scale_shift(bn_params, eps=1e-5):
    gamma, beta, mean, var = bn_params
    scale = gamma / jnp.sqrt(var + eps)
    shift = beta - mean * scale
    return scale, shift


def prepare_block_weights(params, cardinality):
    """Fold inference-mode BN scales into conv weights; bf16 MXU weights."""
    mid = params["w1"].shape[0]
    gs = params["w2"].shape[1]
    s1, b1 = bn_scale_shift(params["bn1"])
    s2, b2 = bn_scale_shift(params["bn2"])
    s3, b3 = bn_scale_shift(params["bn3"])

    prep = {"gs": gs}
    prep["w1"] = (jnp.transpose(params["w1"][:, :, 0, 0], (1, 0))
                  * s1[None, :]).astype(jnp.bfloat16)
    prep["b1"] = b1.reshape(1, -1).astype(jnp.float32)

    w2 = params["w2"]
    if gs == 1:
        # Depthwise taps: (9, mid), tap index = kh*3+kw, scale folded per channel.
        taps = jnp.transpose(w2[:, 0, :, :], (1, 2, 0)).reshape(9, mid)
        prep["w2"] = (taps * s2[None, :]).astype(jnp.float32)
    else:
        # Per-tap block-diagonal (mid, mid) matrices (gs > 1 fallback path).
        w2_np = np.asarray(w2)
        opg = mid // cardinality
        dense = np.zeros((9, mid, mid), np.float32)
        for co in range(mid):
            g = co // opg
            for ci in range(gs):
                for kh in range(3):
                    for kw in range(3):
                        dense[kh * 3 + kw, g * gs + ci, co] = w2_np[co, ci, kh, kw]
        prep["w2"] = jnp.asarray(dense) * s2[None, None, :]
    prep["b2"] = b2.reshape(1, -1).astype(jnp.float32)

    prep["w3"] = (jnp.transpose(params["w3"][:, :, 0, 0], (1, 0))
                  * s3[None, :]).astype(jnp.bfloat16)
    prep["b3"] = b3.reshape(1, -1).astype(jnp.float32)

    if "wd" in params:
        sd, bd = bn_scale_shift(params["bnd"])
        prep["wd"] = (jnp.transpose(params["wd"][:, :, 0, 0], (1, 0))
                      * sd[None, :]).astype(jnp.bfloat16)
        prep["bd"] = bd.reshape(1, -1).astype(jnp.float32)
    return prep


# ------------------------------ Forward pass -------------------------------- #

def resnext_block_forward(x_nchw, params, stride=1, cardinality=32):
    N, Cin, H, W = x_nchw.shape
    prep = prepare_block_weights(params, cardinality)
    mid = prep["w1"].shape[1]
    Cout = prep["w3"].shape[1]
    gs = prep["gs"]

    x = jnp.transpose(x_nchw, (0, 2, 3, 1))          # NHWC (interface glue)
    xs = x[:, ::stride, ::stride, :]                 # stride of the 1x1 convs
    Ho, Wo = xs.shape[1], xs.shape[2]
    M = N * Ho * Wo
    xs_flat = xs.reshape(M, Cin).astype(jnp.bfloat16)

    # conv1(+BN1+ReLU) fused with the downsample 1x1 conv(+BNd) when present.
    if "wd" in prep:
        out1, identity = conv1_with_downsample(xs_flat, prep["w1"], prep["b1"],
                                               prep["wd"], prep["bd"])
    else:
        out1 = matmul_bn(xs_flat, prep["w1"], prep["b1"], relu=True,
                         out_dtype=jnp.bfloat16)
        identity = xs_flat                           # Cin == Cout here

    # Grouped 3x3 conv + BN2 + ReLU (fused, no im2col, no dense zero weights).
    out2 = grouped_conv3x3_bn_relu(out1.reshape(N, Ho, Wo, mid),
                                   prep["w2"], prep["b2"], gs)

    # conv3 + BN3 + residual add + ReLU (fused).
    out3 = matmul_bn(out2.reshape(M, mid), prep["w3"], prep["b3"], relu=True,
                     residual=identity, out_dtype=jnp.float32)

    out = out3.reshape(N, Ho, Wo, Cout)
    return jnp.transpose(out, (0, 3, 1, 2))          # back to NCHW


# --------------------------- Pure-JAX reference ----------------------------- #

def reference_forward(x, params, stride=1, cardinality=32):
    def conv(x, w, stride=1, padding="VALID", groups=1):
        return jax.lax.conv_general_dilated(
            x, w, window_strides=(stride, stride), padding=padding,
            dimension_numbers=("NCHW", "OIHW", "NCHW"),
            feature_group_count=groups)

    def bn(x, p, eps=1e-5):
        gamma, beta, mean, var = p
        g = gamma.reshape(1, -1, 1, 1)
        b = beta.reshape(1, -1, 1, 1)
        m = mean.reshape(1, -1, 1, 1)
        v = var.reshape(1, -1, 1, 1)
        return (x - m) / jnp.sqrt(v + eps) * g + b

    out = jax.nn.relu(bn(conv(x, params["w1"], stride), params["bn1"]))
    out = jax.nn.relu(bn(conv(out, params["w2"], 1, ((1, 1), (1, 1)), cardinality),
                         params["bn2"]))
    out = bn(conv(out, params["w3"]), params["bn3"])
    if "wd" in params:
        identity = bn(conv(x, params["wd"], stride), params["bnd"])
    else:
        identity = x
    return jax.nn.relu(out + identity)


# ----------------------------------- Main ----------------------------------- #

if __name__ == "__main__":
    key = jax.random.PRNGKey(0)
    kx, kp = jax.random.split(key)

    N, Cin, H, W = 2, 32, 8, 8
    Cout, stride, cardinality = 64, 1, 32  # mid=32 -> 32 groups of 1 channel each

    x = jax.random.normal(kx, (N, Cin, H, W), jnp.float32)
    params = init_params(kp, Cin, Cout, stride, cardinality)

    out = resnext_block_forward(x, params, stride, cardinality)
    out = jax.block_until_ready(out)

    ref = reference_forward(x, params, stride, cardinality)
    # bf16 MXU inputs + bf16 inter-stage activations -> loosened tolerance.
    np.testing.assert_allclose(np.asarray(out), np.asarray(ref),
                               rtol=5e-2, atol=5e-2)
    print("KERNEL_OK")
</pallas_src>

<mosaic_0001>
module attributes {stable_mosaic.version = 11 : i64} {
  func.func @_conv1_downsample_kernel(%arg0: i32, %arg1: memref<128x32xbf16, #tpu.memory_space<vmem>>, %arg2: memref<32x32xbf16, #tpu.memory_space<vmem>>, %arg3: memref<32x64xbf16, #tpu.memory_space<vmem>>, %arg4: memref<1x32xf32, #tpu.memory_space<vmem>>, %arg5: memref<1x64xf32, #tpu.memory_space<vmem>>, %arg6: memref<128x32xbf16, #tpu.memory_space<vmem>>, %arg7: memref<128x64xbf16, #tpu.memory_space<vmem>>) attributes {dimension_semantics = [#tpu.dimension_semantics<parallel>], iteration_bounds = array<i64: 1>, scalar_prefetch = 0 : i64, scratch_operands = 0 : i64, tpu.core_type = #tpu.core_type<tc>, window_params = [{transform_indices = @transform_0, window_bounds = array<i64: 128, 32>}, {pipeline_mode = #tpu.pipeline_mode<synchronous>, transform_indices = @transform_1, window_bounds = array<i64: 32, 32>}, {pipeline_mode = #tpu.pipeline_mode<synchronous>, transform_indices = @transform_2, window_bounds = array<i64: 32, 64>}, {pipeline_mode = #tpu.pipeline_mode<synchronous>, transform_indices = @transform_3, window_bounds = array<i64: 1, 32>}, {pipeline_mode = #tpu.pipeline_mode<synchronous>, transform_indices = @transform_4, window_bounds = array<i64: 1, 64>}, {transform_indices = @transform_5, window_bounds = array<i64: 128, 32>}, {transform_indices = @transform_6, window_bounds = array<i64: 128, 64>}]} {
    %c0 = arith.constant 0 : index
    %c0_0 = arith.constant 0 : index
    %0 = vector.load %arg1[%c0, %c0_0] : memref<128x32xbf16, #tpu.memory_space<vmem>>, vector<128x32xbf16>
    %c0_1 = arith.constant 0 : index
    %c0_2 = arith.constant 0 : index
    %1 = vector.load %arg2[%c0_1, %c0_2] : memref<32x32xbf16, #tpu.memory_space<vmem>>, vector<32x32xbf16>
    %cst = arith.constant dense<0.000000e+00> : vector<128x32xf32>
    %2 = tpu.matmul %0, %1, %cst {dimension_numbers = #tpu.dot_dimension_numbers<[1], [0], [0], [1], [0, 0, 1, 1], [], []>} : vector<128x32xbf16>, vector<32x32xbf16>, vector<128x32xf32> -> vector<128x32xf32>
    %c0_3 = arith.constant 0 : index
    %c0_4 = arith.constant 0 : index
    %3 = vector.load %arg4[%c0_3, %c0_4] : memref<1x32xf32, #tpu.memory_space<vmem>>, vector<1x32xf32>
    %4 = vector.broadcast %3 : vector<1x32xf32> to vector<128x32xf32>
    %5 = arith.addf %2, %4 : vector<128x32xf32>
    %cst_5 = arith.constant 0.000000e+00 : f32
    %6 = vector.broadcast %cst_5 : f32 to vector<128x32xf32>
    %7 = arith.maximumf %5, %6 : vector<128x32xf32>
    %8 = arith.truncf %7 : vector<128x32xf32> to vector<128x32xbf16>
    %c0_6 = arith.constant 0 : index
    %c0_7 = arith.constant 0 : index
    %9 = vector.load %arg6[%c0_6, %c0_7] : memref<128x32xbf16, #tpu.memory_space<vmem>>, vector<128x32xbf16>
    tpu.vector_store %arg6[%c0_6, %c0_7], %8 {strides = array<i32>} : memref<128x32xbf16, #tpu.memory_space<vmem>>, vector<128x32xbf16>,
    %c0_8 = arith.constant 0 : index
    %c0_9 = arith.constant 0 : index
    %10 = vector.load %arg3[%c0_8, %c0_9] : memref<32x64xbf16, #tpu.memory_space<vmem>>, vector<32x64xbf16>
    %cst_10 = arith.constant dense<0.000000e+00> : vector<128x64xf32>
    %11 = tpu.matmul %0, %10, %cst_10 {dimension_numbers = #tpu.dot_dimension_numbers<[1], [0], [0], [1], [0, 0, 1, 1], [], []>} : vector<128x32xbf16>, vector<32x64xbf16>, vector<128x64xf32> -> vector<128x64xf32>
    %c0_11 = arith.constant 0 : index
    %c0_12 = arith.constant 0 : index
    %12 = vector.load %arg5[%c0_11, %c0_12] : memref<1x64xf32, #tpu.memory_space<vmem>>, vector<1x64xf32>
    %13 = vector.broadcast %12 : vector<1x64xf32> to vector<128x64xf32>
    %14 = arith.addf %11, %13 : vector<128x64xf32>
    %15 = arith.truncf %14 : vector<128x64xf32> to vector<128x64xbf16>
    %c0_13 = arith.constant 0 : index
    %c0_14 = arith.constant 0 : index
    %16 = vector.load %arg7[%c0_13, %c0_14] : memref<128x64xbf16, #tpu.memory_space<vmem>>, vector<128x64xbf16>
    tpu.vector_store %arg7[%c0_13, %c0_14], %15 {strides = array<i32>} : memref<128x64xbf16, #tpu.memory_space<vmem>>, vector<128x64xbf16>,
    return
  }
  func.func @transform_0(%arg0: i32) -> (i32, i32) {
    %c0_i32 = arith.constant 0 : i32
    %c0_i32_0 = arith.constant 0 : i32
    return %arg0, %c0_i32 : i32, i32
  }
  func.func @transform_1(%arg0: i32) -> (i32, i32) {
    %c0_i32 = arith.constant 0 : i32
    %c0_i32_0 = arith.constant 0 : i32
    %c0_i32_1 = arith.constant 0 : i32
    return %c0_i32, %c0_i32_0 : i32, i32
  }
  func.func @transform_2(%arg0: i32) -> (i32, i32) {
    %c0_i32 = arith.constant 0 : i32
    %c0_i32_0 = arith.constant 0 : i32
    %c0_i32_1 = arith.constant 0 : i32
    return %c0_i32, %c0_i32_0 : i32, i32
  }
  func.func @transform_3(%arg0: i32) -> (i32, i32) {
    %c0_i32 = arith.constant 0 : i32
    %c0_i32_0 = arith.constant 0 : i32
    %c0_i32_1 = arith.constant 0 : i32
    return %c0_i32, %c0_i32_0 : i32, i32
  }
  func.func @transform_4(%arg0: i32) -> (i32, i32) {
    %c0_i32 = arith.constant 0 : i32
    %c0_i32_0 = arith.constant 0 : i32
    %c0_i32_1 = arith.constant 0 : i32
    return %c0_i32, %c0_i32_0 : i32, i32
  }
  func.func @transform_5(%arg0: i32) -> (i32, i32) {
    %c0_i32 = arith.constant 0 : i32
    %c0_i32_0 = arith.constant 0 : i32
    return %arg0, %c0_i32 : i32, i32
  }
  func.func @transform_6(%arg0: i32) -> (i32, i32) {
    %c0_i32 = arith.constant 0 : i32
    %c0_i32_0 = arith.constant 0 : i32
    return %arg0, %c0_i32 : i32, i32
  }
}

</mosaic_0001>

<bundles_post_ra>
// kernel: tpu_custom_call.1
= control target key start
LH: loop header
LB: loop body
LE: loop exit
PB: predicated region body
PF: predicated region fallthrough
CT: control target
= control target key end

     0   :  { %vm102_vm0 = vcmask 261120   ;;  %vm304_vm1 = vcmask 257024   ;;  %vm505_vm2 = vcmask 519168   ;;  %s953_s1 = inlined_call_operand.vmem [shape: bf16[32,32], index: 1, kind: input, shape index: {}]   ;;  %s954_s2 = inlined_call_operand.vmem [shape: bf16[32,64], index: 2, kind: input, shape index: {}]   ;;  %s955_s0 = inlined_call_operand.vmem [shape: bf16[128,32], index: 0, kind: input, shape index: {}]   ;;  %s956_s3 = inlined_call_operand.vmem [shape: f32[1,32], index: 3, kind: input, shape index: {}]   ;;  %s957_s4 = inlined_call_operand.vmem [shape: f32[1,64], index: 4, kind: input, shape index: {}]   ;;  %s958_s6 = inlined_call_operand.vmem [shape: bf16[128,64], index: 6, kind: output, shape index: {1}]   ;;  %s959_s5 = inlined_call_operand.vmem [shape: bf16[128,32], index: 5, kind: output, shape index: {0}]  }
   0x1   :  { %v684_v0 = vld [vmem:[%s953_s1] sm:$0xff]   ;;  %v686_v2 = vld [vmem:[%s953_s1 + $0x8] sm:$0xff]   ;;  %v690_v6 = vld [vmem:[%s955_s0 + $0x10] sm:$0xff]  }
   0x2   :  { %v685_v1 = vld [vmem:[%s954_s2] sm:$0xff]   ;;  %644 = vmatprep.subr.bf16.mxu0 %v684_v0  ;;  %v687_v3 = vld [vmem:[%s954_s2 + $0x8] sm:$0xff]   ;;  %v691_v7 = vld [vmem:[%s955_s0 + $0x18] sm:$0xff]  }
   0x3   :  { %664 = vmatprep.subr.bf16.mxu1 %v685_v1  ;;  %645 = vmatpush3.bf16.msra.mxu0 %v684_v0  ;;  %v688_v4 = vld [vmem:[%s955_s0] sm:$0xff]   ;;  %v689_v5 = vld [vmem:[%s955_s0 + $0x8] sm:$0xff]   ;;  %v694_v10 = vld [vmem:[%s955_s0 + $0x30] sm:$0xff]  }
   0x4   :  { %665 = vmatpush3.bf16.msra.mxu1 %v685_v1  ;;  %646 = vmatprep.subr.bf16.mxu0 %v686_v2  ;;  %v692_v8 = vld [vmem:[%s955_s0 + $0x20] sm:$0xff]   ;;  %v693_v9 = vld [vmem:[%s955_s0 + $0x28] sm:$0xff]   ;;  %v695_v11 = vld [vmem:[%s955_s0 + $0x38] sm:$0xff]  }
   0x5   :  { %666 = vmatprep.subr.bf16.mxu1 %v687_v3  ;;  %648 = vmatprep.mubr.msk.bf16.mxu0 %vm102_vm0, %v688_v4  ;;  %v786_v12 = vld [vmem:[%s956_s3] ss:$0 sm:$0xff] }
   0x6   :  { %668 = vmatprep.mubr.msk.bf16.mxu1 %vm102_vm0, %v688_v4  ;;  %v791_v13 = vld [vmem:[%s957_s4] ss:$0 sm:$0xff] }
   0x7   :  { %647 = vmatpush3.bf16.msra.mxu0 %v686_v2 }
   0x8   :  { %667 = vmatpush3.bf16.msra.mxu1 %v687_v3 }
   0xa   :  { %649 = vmatmul.mubr.msk.bf16.vlgmr.msra.gmra.mrb[0].mxu0 %vm102_vm0, %v689_v5 }
   0xb   :  { %669 = vmatmul.mubr.msk.bf16.vlgmr.msra.gmra.mrb[0].mxu1 %vm102_vm0, %v689_v5  ;;  %652 = vmatprep.mubr.msk.bf16.mxu0 %vm102_vm0, %v690_v6 }
   0xc   :  { %672 = vmatprep.mubr.msk.bf16.mxu1 %vm102_vm0, %v690_v6 }
  0x12   :  { %653 = vmatmul.mubr.msk.bf16.gmra.mrb[4].mxu0 %vm102_vm0, %v691_v7 }
  0x13   :  { %673 = vmatmul.mubr.msk.bf16.gmra.mrb[4].mxu1 %vm102_vm0, %v691_v7  ;;  %656 = vmatprep.mubr.msk.bf16.mxu0 %vm102_vm0, %v692_v8 }
  0x14   :  { %676 = vmatprep.mubr.msk.bf16.mxu1 %vm102_vm0, %v692_v8 }
  0x1a   :  { %657 = vmatmul.mubr.msk.bf16.gmra.mrb[8].mxu0 %vm102_vm0, %v693_v9 }
  0x1b   :  { %677 = vmatmul.mubr.msk.bf16.gmra.mrb[8].mxu1 %vm102_vm0, %v693_v9  ;;  %660 = vmatprep.mubr.msk.bf16.mxu0 %vm102_vm0, %v694_v10 }
  0x1c   :  { %680 = vmatprep.mubr.msk.bf16.mxu1 %vm102_vm0, %v694_v10 }
  0x22   :  { %661 = vmatmul.mubr.msk.bf16.gmra.mrb[12].mxu0 %vm102_vm0, %v695_v11 }
  0x23   :  { %681 = vmatmul.mubr.msk.bf16.gmra.mrb[12].mxu1 %vm102_vm0, %v695_v11 }
  0xdd   :  { %v650_v14 = vpop.f32.mrb[0].mxu0 }
  0xde   :  { %v170_v15 = vadd.f32 %v650_v14, %v786_v12  ;;  %v670_v16 = vpop.f32.mrb[0].mxu1  ;;  %v161_v17 = vpop.f32.mrb[1].mxu0 }
  0xdf   :  { %v387_v18 = vadd.f32 %v670_v16, %v791_v13  ;;  %v162_v19 = vadd.f32 %v786_v12, %v161_v17  ;;  %v378_v20 = vpop.f32.mrb[1].mxu1  ;;  %v651_v21 = vpop.f32.mrb[2].mxu0 }
  0xe0   :  { %v226_v22 = vmax.f32 %v170_v15, 0.0  ;;  %v379_v23 = vadd.f32 %v791_v13, %v378_v20  ;;  %v173_v24 = vadd.f32 %v651_v21, %v786_v12  ;;  %v671_v25 = vpop.f32.mrb[2].mxu1  ;;  %v164_v26 = vpop.f32.mrb[3].mxu0 }
  0xe1   :  { %v610_v27 = vpack.c.bf16 %v387_v18, %v387_v18  ;;  %v224_v28 = vmax.f32 %v162_v19, 0.0  ;;  %v390_v29 = vadd.f32 %v671_v25, %v791_v13  ;;  %v165_v30 = vadd.f32 %v786_v12, %v164_v26  ;;  %v381_v31 = vpop.f32.mrb[3].mxu1 }
  0xe2   :  { %v594_v32 = vpack.c.bf16 %v226_v22, %v226_v22  ;;  %v608_v33 = vpack.c.bf16 %v379_v23, %v379_v23  ;;  %v227_v34 = vmax.f32 %v173_v24, 0.0  ;;  %v382_v35 = vadd.f32 %v791_v13, %v381_v31 }
  0xe3   :  { %508 = vst.msk [vmem:[%s958_s6 + $0x8] sm:$0xf] %vm505_vm2, %v610_v27  ;;  %v592_v36 = vpack.c.bf16 %v224_v28, %v224_v28  ;;  %v611_v37 = vpack.c.bf16 %v390_v29, %v390_v29  ;;  %v225_v38 = vmax.f32 %v165_v30, 0.0 }
  0xe4   :  { %307 = vst.msk [vmem:[%s959_s5 + $0x8] sm:$0xf] %vm304_vm1, %v594_v32  ;;  %v595_v39 = vpack.c.bf16 %v227_v34, %v227_v34  ;;  %v609_v40 = vpack.c.bf16 %v382_v35, %v382_v35 }
  0xe5   :  { %506 = vst.msk [vmem:[%s958_s6] sm:$0xf] %vm505_vm2, %v608_v33  ;;  %509 = vst.msk [vmem:[%s958_s6 + $0xc] sm:$0xf] %vm505_vm2, %v611_v37  ;;  %v593_v41 = vpack.c.bf16 %v225_v38, %v225_v38  ;;  %v654_v42 = vpop.f32.mrb[4].mxu0 }
  0xe6   :  { %305 = vst.msk [vmem:[%s959_s5] sm:$0xf] %vm304_vm1, %v592_v36  ;;  %308 = vst.msk [vmem:[%s959_s5 + $0xc] sm:$0xf] %vm304_vm1, %v595_v39  ;;  %v186_v43 = vadd.f32 %v654_v42, %v786_v12  ;;  %v674_v44 = vpop.f32.mrb[4].mxu1  ;;  %v177_v45 = vpop.f32.mrb[5].mxu0 }
  0xe7   :  { %507 = vst.msk [vmem:[%s958_s6 + $0x4] sm:$0xf] %vm505_vm2, %v609_v40  ;;  %v403_v46 = vadd.f32 %v674_v44, %v791_v13  ;;  %v178_v47 = vadd.f32 %v786_v12, %v177_v45  ;;  %v394_v48 = vpop.f32.mrb[5].mxu1  ;;  %v655_v49 = vpop.f32.mrb[6].mxu0 }
  0xe8   :  { %306 = vst.msk [vmem:[%s959_s5 + $0x4] sm:$0xf] %vm304_vm1, %v593_v41  ;;  %v230_v50 = vmax.f32 %v186_v43, 0.0  ;;  %v395_v51 = vadd.f32 %v791_v13, %v394_v48  ;;  %v189_v52 = vadd.f32 %v655_v49, %v786_v12  ;;  %v675_v53 = vpop.f32.mrb[6].mxu1  ;;  %v180_v54 = vpop.f32.mrb[7].mxu0 }
  0xe9   :  { %v614_v55 = vpack.c.bf16 %v403_v46, %v403_v46  ;;  %v228_v56 = vmax.f32 %v178_v47, 0.0  ;;  %v406_v57 = vadd.f32 %v675_v53, %v791_v13  ;;  %v181_v58 = vadd.f32 %v786_v12, %v180_v54  ;;  %v397_v59 = vpop.f32.mrb[7].mxu1 }
  0xea   :  { %v598_v60 = vpack.c.bf16 %v230_v50, %v230_v50  ;;  %v612_v61 = vpack.c.bf16 %v395_v51, %v395_v51  ;;  %v231_v62 = vmax.f32 %v189_v52, 0.0  ;;  %v398_v63 = vadd.f32 %v791_v13, %v397_v59 }
  0xeb   :  { %512 = vst.msk [vmem:[%s958_s6 + $0x18] sm:$0xf] %vm505_vm2, %v614_v55  ;;  %v596_v0 = vpack.c.bf16 %v228_v56, %v228_v56  ;;  %v615_v1 = vpack.c.bf16 %v406_v57, %v406_v57  ;;  %v229_v2 = vmax.f32 %v181_v58, 0.0 }
  0xec   :  { %311 = vst.msk [vmem:[%s959_s5 + $0x18] sm:$0xf] %vm304_vm1, %v598_v60  ;;  %v599_v3 = vpack.c.bf16 %v231_v62, %v231_v62  ;;  %v613_v4 = vpack.c.bf16 %v398_v63, %v398_v63 }
  0xed   :  { %510 = vst.msk [vmem:[%s958_s6 + $0x10] sm:$0xf] %vm505_vm2, %v612_v61  ;;  %513 = vst.msk [vmem:[%s958_s6 + $0x1c] sm:$0xf] %vm505_vm2, %v615_v1  ;;  %v597_v5 = vpack.c.bf16 %v229_v2, %v229_v2  ;;  %v658_v6 = vpop.f32.mrb[8].mxu0 }
  0xee   :  { %309 = vst.msk [vmem:[%s959_s5 + $0x10] sm:$0xf] %vm304_vm1, %v596_v0  ;;  %312 = vst.msk [vmem:[%s959_s5 + $0x1c] sm:$0xf] %vm304_vm1, %v599_v3  ;;  %v202_v7 = vadd.f32 %v658_v6, %v786_v12  ;;  %v678_v8 = vpop.f32.mrb[8].mxu1  ;;  %v193_v9 = vpop.f32.mrb[9].mxu0 }
  0xef   :  { %511 = vst.msk [vmem:[%s958_s6 + $0x14] sm:$0xf] %vm505_vm2, %v613_v4  ;;  %v419_v10 = vadd.f32 %v678_v8, %v791_v13  ;;  %v194_v11 = vadd.f32 %v786_v12, %v193_v9  ;;  %v410_v14 = vpop.f32.mrb[9].mxu1  ;;  %v659_v15 = vpop.f32.mrb[10].mxu0 }
  0xf0   :  { %310 = vst.msk [vmem:[%s959_s5 + $0x14] sm:$0xf] %vm304_vm1, %v597_v5  ;;  %v234_v16 = vmax.f32 %v202_v7, 0.0  ;;  %v411_v17 = vadd.f32 %v791_v13, %v410_v14  ;;  %v205_v18 = vadd.f32 %v659_v15, %v786_v12  ;;  %v679_v19 = vpop.f32.mrb[10].mxu1  ;;  %v196_v20 = vpop.f32.mrb[11].mxu0 }
  0xf1   :  { %v618_v21 = vpack.c.bf16 %v419_v10, %v419_v10  ;;  %v232_v22 = vmax.f32 %v194_v11, 0.0  ;;  %v422_v23 = vadd.f32 %v679_v19, %v791_v13  ;;  %v197_v24 = vadd.f32 %v786_v12, %v196_v20  ;;  %v413_v25 = vpop.f32.mrb[11].mxu1 }
  0xf2   :  { %v602_v26 = vpack.c.bf16 %v234_v16, %v234_v16  ;;  %v616_v27 = vpack.c.bf16 %v411_v17, %v411_v17  ;;  %v235_v28 = vmax.f32 %v205_v18, 0.0  ;;  %v414_v29 = vadd.f32 %v791_v13, %v413_v25 }
  0xf3   :  { %516 = vst.msk [vmem:[%s958_s6 + $0x28] sm:$0xf] %vm505_vm2, %v618_v21  ;;  %v600_v30 = vpack.c.bf16 %v232_v22, %v232_v22  ;;  %v619_v31 = vpack.c.bf16 %v422_v23, %v422_v23  ;;  %v233_v32 = vmax.f32 %v197_v24, 0.0 }
  0xf4   :  { %315 = vst.msk [vmem:[%s959_s5 + $0x28] sm:$0xf] %vm304_vm1, %v602_v26  ;;  %v603_v33 = vpack.c.bf16 %v235_v28, %v235_v28  ;;  %v617_v34 = vpack.c.bf16 %v414_v29, %v414_v29 }
  0xf5   :  { %514 = vst.msk [vmem:[%s958_s6 + $0x20] sm:$0xf] %vm505_vm2, %v616_v27  ;;  %517 = vst.msk [vmem:[%s958_s6 + $0x2c] sm:$0xf] %vm505_vm2, %v619_v31  ;;  %v601_v35 = vpack.c.bf16 %v233_v32, %v233_v32  ;;  %v662_v36 = vpop.f32.mrb[12].mxu0 }
  0xf6   :  { %313 = vst.msk [vmem:[%s959_s5 + $0x20] sm:$0xf] %vm304_vm1, %v600_v30  ;;  %316 = vst.msk [vmem:[%s959_s5 + $0x2c] sm:$0xf] %vm304_vm1, %v603_v33  ;;  %v218_v37 = vadd.f32 %v662_v36, %v786_v12  ;;  %v682_v38 = vpop.f32.mrb[12].mxu1  ;;  %v209_v39 = vpop.f32.mrb[13].mxu0 }
  0xf7   :  { %515 = vst.msk [vmem:[%s958_s6 + $0x24] sm:$0xf] %vm505_vm2, %v617_v34  ;;  %v435_v40 = vadd.f32 %v682_v38, %v791_v13  ;;  %v210_v41 = vadd.f32 %v786_v12, %v209_v39  ;;  %v426_v42 = vpop.f32.mrb[13].mxu1  ;;  %v663_v43 = vpop.f32.mrb[14].mxu0 }
  0xf8   :  { %314 = vst.msk [vmem:[%s959_s5 + $0x24] sm:$0xf] %vm304_vm1, %v601_v35  ;;  %v238_v44 = vmax.f32 %v218_v37, 0.0  ;;  %v427_v45 = vadd.f32 %v791_v13, %v426_v42  ;;  %v221_v46 = vadd.f32 %v663_v43, %v786_v12  ;;  %v683_v47 = vpop.f32.mrb[14].mxu1  ;;  %v212_v48 = vpop.f32.mrb[15].mxu0 }
  0xf9   :  { %v622_v49 = vpack.c.bf16 %v435_v40, %v435_v40  ;;  %v236_v50 = vmax.f32 %v210_v41, 0.0  ;;  %v438_v51 = vadd.f32 %v683_v47, %v791_v13  ;;  %v213_v52 = vadd.f32 %v786_v12, %v212_v48  ;;  %v429_v53 = vpop.f32.mrb[15].mxu1 }
  0xfa   :  { %v606_v54 = vpack.c.bf16 %v238_v44, %v238_v44  ;;  %v620_v55 = vpack.c.bf16 %v427_v45, %v427_v45  ;;  %v239_v56 = vmax.f32 %v221_v46, 0.0  ;;  %v430_v57 = vadd.f32 %v791_v13, %v429_v53 }
  0xfb   :  { %520 = vst.msk [vmem:[%s958_s6 + $0x38] sm:$0xf] %vm505_vm2, %v622_v49  ;;  %v604_v58 = vpack.c.bf16 %v236_v50, %v236_v50  ;;  %v623_v59 = vpack.c.bf16 %v438_v51, %v438_v51  ;;  %v237_v60 = vmax.f32 %v213_v52, 0.0 }
  0xfc   :  { %319 = vst.msk [vmem:[%s959_s5 + $0x38] sm:$0xf] %vm304_vm1, %v606_v54  ;;  %v607_v12 = vpack.c.bf16 %v239_v56, %v239_v56  ;;  %v621_v13 = vpack.c.bf16 %v430_v57, %v430_v57 }
  0xfd   :  { %518 = vst.msk [vmem:[%s958_s6 + $0x30] sm:$0xf] %vm505_vm2, %v620_v55  ;;  %521 = vst.msk [vmem:[%s958_s6 + $0x3c] sm:$0xf] %vm505_vm2, %v623_v59  ;;  %v605_v61 = vpack.c.bf16 %v237_v60, %v237_v60 }
  0xfe   :  { %317 = vst.msk [vmem:[%s959_s5 + $0x30] sm:$0xf] %vm304_vm1, %v604_v58  ;;  %320 = vst.msk [vmem:[%s959_s5 + $0x3c] sm:$0xf] %vm304_vm1, %v607_v12 }
  0xff   :  { %519 = vst.msk [vmem:[%s958_s6 + $0x34] sm:$0xf] %vm505_vm2, %v621_v13 }
 0x100   :  { %318 = vst.msk [vmem:[%s959_s5 + $0x34] sm:$0xf] %vm304_vm1, %v605_v61 }

</bundles_post_ra>
